<compile_context>
chip_gen: v6e
topology: v6e:2x2x1
jax: 0.10.0
libtpu: 0.0.40
codegen_flags: <defaults>
</compile_context>

<pallas_src>
import functools

import jax
import jax.numpy as jnp
from jax.experimental import pallas as pl
from jax.experimental.pallas import tpu as pltpu


# ----------------------------------------------------------------------------
# Small helpers
# ----------------------------------------------------------------------------
def _round_up(x, m):
    return (x + m - 1) // m * m


_BUFFERED1_SUPPORTED = None


def _buffered1_supported():
    """Probe once whether pipeline_mode=pl.Buffered(1) compiles on this backend."""
    global _BUFFERED1_SUPPORTED
    if _BUFFERED1_SUPPORTED is None:
        def _copy(x_ref, o_ref):
            o_ref[...] = x_ref[...] + 0.0
        try:
            out = pl.pallas_call(
                _copy,
                out_shape=jax.ShapeDtypeStruct((8, 128), jnp.float32),
                grid=(2,),
                in_specs=[pl.BlockSpec((8, 128), lambda i: (0, 0),
                                       pipeline_mode=pl.Buffered(1))],
                out_specs=pl.BlockSpec((8, 128), lambda i: (0, 0)),
            )(jnp.ones((8, 128), jnp.float32))
            jax.block_until_ready(out)
            _BUFFERED1_SUPPORTED = bool(jnp.allclose(out, 1.0))
        except Exception:
            _BUFFERED1_SUPPORTED = False
    return _BUFFERED1_SUPPORTED


def _vmem_capacity_bytes():
    try:
        return int(pltpu.get_tpu_info().vmem_capacity_bytes)
    except Exception:
        return 64 * 1024 * 1024      # v7x per-TC floor; conservative elsewhere


def _pick_row_tile(n, row_tile, b_pad, vmem_bytes):
    """Pick a row tile (multiple of 128) that divides the padded N exactly."""
    n128 = _round_up(n, 128)
    if row_tile is not None:
        cand = _round_up(int(row_tile), 128)
    else:
        # Streamed bytes per grid step: A tile (tm, n128) bf16 and two S tiles
        # (b_pad, tm) bf16, each double-buffered.  Spend ~40% of VMEM on them.
        budget = int(vmem_bytes * 0.4)
        denom = 2 * 2 * (n128 + 2 * b_pad)           # bytes per tile row
        cand = max(128, (budget // max(denom, 1)) // 128 * 128)
        cand = min(cand, 1024)
    cand = max(128, min(cand, n128))
    # Largest multiple of 128 <= cand that divides n128 (no monolithic fallback).
    blocks = n128 // 128
    k = min(cand // 128, blocks)
    while blocks % k != 0:
        k -= 1
    return k * 128, n128


# ----------------------------------------------------------------------------
# Kernel bodies
# ----------------------------------------------------------------------------
def _gcn_tile(a_ref, xw_ref, bg_ref):
    """h_tile = relu(A_tile @ XW + bg); bf16 MXU operands, f32 epilogue."""
    h = jnp.dot(a_ref[...], xw_ref[...], preferred_element_type=jnp.float32)
    return jnp.maximum(h + bg_ref[...], 0.0)


def _accumulate_gather(s1_ref, s2_ref, h_bf16, x1_acc, x2_acc):
    """Incremental one-hot gather: xk += Sk[:, tile] @ h_tile (MXU, f32 acc)."""
    x1_acc[...] += jnp.dot(s1_ref[...], h_bf16, preferred_element_type=jnp.float32)
    x2_acc[...] += jnp.dot(s2_ref[...], h_bf16, preferred_element_type=jnp.float32)


def _concat_kernel(a_ref, xw_ref, bg_ref, s1_ref, s2_ref, w1_ref, w2_ref,
                   bfc_ref, o_ref, x1_acc, x2_acc):
    i = pl.program_id(0)

    @pl.when(i == 0)
    def _():
        x1_acc[...] = jnp.zeros_like(x1_acc)
        x2_acc[...] = jnp.zeros_like(x2_acc)

    h = _gcn_tile(a_ref, xw_ref, bg_ref).astype(jnp.bfloat16)
    _accumulate_gather(s1_ref, s2_ref, h, x1_acc, x2_acc)

    @pl.when(i == pl.num_programs(0) - 1)
    def _():
        # fc(concat([x1, x2])) == x1 @ Wfc[:D] + x2 @ Wfc[D:] + bfc
        o_ref[...] = (
            jnp.dot(x1_acc[...].astype(jnp.bfloat16), w1_ref[...],
                    preferred_element_type=jnp.float32)
            + jnp.dot(x2_acc[...].astype(jnp.bfloat16), w2_ref[...],
                      preferred_element_type=jnp.float32)
            + bfc_ref[...]
        )


def _mul_kernel(a_ref, xw_ref, bg_ref, s1_ref, s2_ref, w_ref,
                bfc_ref, o_ref, x1_acc, x2_acc):
    i = pl.program_id(0)

    @pl.when(i == 0)
    def _():
        x1_acc[...] = jnp.zeros_like(x1_acc)
        x2_acc[...] = jnp.zeros_like(x2_acc)

    h = _gcn_tile(a_ref, xw_ref, bg_ref).astype(jnp.bfloat16)
    _accumulate_gather(s1_ref, s2_ref, h, x1_acc, x2_acc)

    @pl.when(i == pl.num_programs(0) - 1)
    def _():
        fused = (x1_acc[...] * x2_acc[...]).astype(jnp.bfloat16)  # f32 epilogue
        o_ref[...] = (
            jnp.dot(fused, w_ref[...], preferred_element_type=jnp.float32)
            + bfc_ref[...]
        )


# ----------------------------------------------------------------------------
# Wrapper: one fused pallas_call for the whole forward.
# ----------------------------------------------------------------------------
@functools.partial(
    jax.jit,
    static_argnames=("feature_fusion", "row_tile", "single_buffer_consts"))
def _ppi_forward(params, adj, feat, prot1, prot2, *, feature_fusion, row_tile,
                 single_buffer_consts):
    f32, bf16 = jnp.float32, jnp.bfloat16
    n, _ = feat.shape
    d = params["wg"].shape[1]
    c = params["wfc"].shape[1]
    b = prot1.shape[0]

    b_pad = _round_up(b, 8)        # sublane / MXU friendly batch
    c_pad = _round_up(c, 128)      # lane-dense output (unmasked vst)
    d_pad = _round_up(d, 128)      # lane-dense hidden dim

    vmem_cap = _vmem_capacity_bytes()
    tm, n_pad = _pick_row_tile(n, row_tile, b_pad, vmem_cap)
    grid = (n_pad // tm,)

    # ---- Hoisted / padded operands (cheap XLA ops, outside the kernel) ----
    xw = feat.astype(f32) @ params["wg"].astype(f32)          # X @ Wg hoisted
    xw_p = jnp.zeros((n_pad, d_pad), bf16).at[:n, :d].set(xw.astype(bf16))
    a_p = jnp.zeros((n_pad, n_pad), bf16).at[:n, :n].set(adj.astype(bf16))
    bg_p = jnp.zeros((1, d_pad), f32).at[:, :d].set(params["bg"].astype(f32))
    bfc_p = jnp.zeros((1, c_pad), f32).at[:, :c].set(params["bfc"].astype(f32))

    # One-hot gather matrices; padded rows/columns are zero so padded H rows and
    # padded batch rows contribute nothing.
    s1 = jnp.zeros((b_pad, n_pad), bf16).at[:b, :n].set(
        jax.nn.one_hot(prot1, n, dtype=bf16))
    s2 = jnp.zeros((b_pad, n_pad), bf16).at[:b, :n].set(
        jax.nn.one_hot(prot2, n, dtype=bf16))

    wfc = params["wfc"]
    if feature_fusion == "concat":
        assert wfc.shape[0] == 2 * d
        w1 = jnp.zeros((d_pad, c_pad), bf16).at[:d, :c].set(wfc[:d].astype(bf16))
        w2 = jnp.zeros((d_pad, c_pad), bf16).at[:d, :c].set(wfc[d:].astype(bf16))
        head_args = (w1, w2)
        kernel = _concat_kernel
    else:  # elementwise multiply fusion
        assert wfc.shape[0] == d
        w = jnp.zeros((d_pad, c_pad), bf16).at[:d, :c].set(wfc.astype(bf16))
        head_args = (w,)
        kernel = _mul_kernel

    # ---- BlockSpecs ----
    const2 = lambda i: (0, 0)

    def resident(shape):
        # Constant-index-map operand: single-buffer it when supported.
        if single_buffer_consts:
            return pl.BlockSpec(shape, const2, pipeline_mode=pl.Buffered(1))
        return pl.BlockSpec(shape, const2)

    in_specs = [
        pl.BlockSpec((tm, n_pad), lambda i: (i, 0)),      # A: streamed row tiles
        resident((n_pad, d_pad)),                         # XW (resident)
        resident((1, d_pad)),                             # bg
        pl.BlockSpec((b_pad, tm), lambda i: (0, i)),      # S1: streamed col tiles
        pl.BlockSpec((b_pad, tm), lambda i: (0, i)),      # S2
        *[resident((d_pad, c_pad)) for _ in head_args],   # head weight(s)
        resident((1, c_pad)),                             # bfc
    ]

    # ---- Explicit scoped-VMEM budget (defaults are exceeded on real graphs
    # long before physical capacity) ----
    nbuf_const = 1 if single_buffer_consts else 2
    vmem_bytes = (
        2 * tm * n_pad * 2                                # A tiles (double buf)
        + 2 * 2 * b_pad * tm * 2                          # S1 + S2 tiles
        + nbuf_const * n_pad * d_pad * 2                  # XW
        + nbuf_const * 8 * d_pad * 4                      # bg (sublane-padded)
        + len(head_args) * nbuf_const * d_pad * c_pad * 2 # head weights
        + nbuf_const * 8 * c_pad * 4                      # bfc
        + 2 * b_pad * c_pad * 4                           # output block
        + 2 * b_pad * d_pad * 4                           # x1/x2 accumulators
    )
    vmem_limit = int(vmem_bytes * 1.5) + (2 << 20)
    vmem_limit = max(16 << 20, min(vmem_limit, min(vmem_cap, 128 << 20)))

    out = pl.pallas_call(
        kernel,
        out_shape=jax.ShapeDtypeStruct((b_pad, c_pad), jnp.float32),
        grid=grid,
        in_specs=in_specs,
        out_specs=pl.BlockSpec((b_pad, c_pad), const2),
        scratch_shapes=[pltpu.VMEM((b_pad, d_pad), jnp.float32),   # x1 accumulator
                        pltpu.VMEM((b_pad, d_pad), jnp.float32)],  # x2 accumulator
        compiler_params=pltpu.CompilerParams(
            # The x1/x2 accumulators carry across the row-tile axis, so it must
            # stay sequential.
            # TODO(synk): on v7x, split this axis across the two TensorCores
            # with per-core partial accumulators and a tiny combine step.
            dimension_semantics=("arbitrary",),
            vmem_limit_bytes=int(vmem_limit),
        ),
    )(a_p, xw_p, bg_p, s1, s2, *head_args, bfc_p)

    return out[:b, :c]


def ppi_forward(params, adj, feat, prot1, prot2, *, feature_fusion="concat",
                row_tile=None):
    return _ppi_forward(
        params, adj, feat, prot1, prot2,
        feature_fusion=feature_fusion, row_tile=row_tile,
        single_buffer_consts=_buffered1_supported())


# ----------------------------------------------------------------------------
# Pure-JAX semantic reference (full f32).
# ----------------------------------------------------------------------------
def _reference_forward(params, adj, feat, prot1, prot2, feature_fusion):
    h = jnp.maximum((adj @ feat) @ params["wg"] + params["bg"], 0.0)
    x1, x2 = h[prot1], h[prot2]
    if feature_fusion == "concat":
        x = jnp.concatenate([x1, x2], axis=1)
    else:
        x = x1 * x2
    return x @ params["wfc"] + params["bfc"]


if __name__ == "__main__":
    # Small, deterministic shapes (multi-step grid exercised via row_tile=128).
    N = 256          # graph nodes (proteins)
    F_IN = 64        # input node-feature dim
    D = 128          # graph_encoder.output_dim
    B = 4            # protein pairs
    NUM_CLASSES = 8

    key = jax.random.PRNGKey(0)
    k_adj, k_feat, k_wg, k_bg, k_wc, k_bc, k_wm, k_p1, k_p2 = jax.random.split(key, 9)

    # Symmetric row-normalized adjacency with self-loops (dense "graph" input).
    a_raw = (jax.random.uniform(k_adj, (N, N)) > 0.7).astype(jnp.float32)
    a_sym = jnp.clip(a_raw + a_raw.T, 0.0, 1.0) + jnp.eye(N, dtype=jnp.float32)
    adj = a_sym / jnp.sum(a_sym, axis=1, keepdims=True)

    feat = jax.random.normal(k_feat, (N, F_IN), dtype=jnp.float32)
    prot1 = jax.random.randint(k_p1, (B,), 0, N, dtype=jnp.int32)
    prot2 = jax.random.randint(k_p2, (B,), 0, N, dtype=jnp.int32)

    base = {
        "wg": jax.random.normal(k_wg, (F_IN, D), dtype=jnp.float32) * 0.1,
        "bg": jax.random.normal(k_bg, (1, D), dtype=jnp.float32) * 0.1,
    }
    cases = {
        "concat": dict(
            base,
            wfc=jax.random.normal(k_wc, (2 * D, NUM_CLASSES), dtype=jnp.float32) * 0.1,
            bfc=jax.random.normal(k_bc, (1, NUM_CLASSES), dtype=jnp.float32) * 0.1),
        "mul": dict(
            base,
            wfc=jax.random.normal(k_wm, (D, NUM_CLASSES), dtype=jnp.float32) * 0.1,
            bfc=jax.random.normal(k_bc, (1, NUM_CLASSES), dtype=jnp.float32) * 0.1),
    }

    # TODO(synk): the original graph_encoder is a config-selected external module
    # (SUPPORTED_KNOWLEDGE_ENCODER); a single dense-GCN layer stands in for it.
    for fusion, params in cases.items():
        out = ppi_forward(params, adj, feat, prot1, prot2,
                          feature_fusion=fusion, row_tile=128)   # grid of 2 steps
        out = jax.block_until_ready(out)
        ref = _reference_forward(params, adj, feat, prot1, prot2, fusion)
        assert out.shape == (B, NUM_CLASSES)
        err = float(jnp.max(jnp.abs(out - ref)))
        # bf16 MXU operands with f32 accumulation vs. pure-f32 reference.
        assert jnp.allclose(out, ref, atol=2e-2, rtol=2e-2), (fusion, err)

    print("KERNEL_OK")
</pallas_src>

<mosaic_0001>
module attributes {stable_mosaic.version = 11 : i64} {
  func.func @_copy(%arg0: i32, %arg1: memref<8x128xf32, #tpu.memory_space<vmem>>, %arg2: memref<8x128xf32, #tpu.memory_space<vmem>>) attributes {dimension_semantics = [#tpu.dimension_semantics<arbitrary>], iteration_bounds = array<i64: 2>, scalar_prefetch = 0 : i64, scratch_operands = 0 : i64, tpu.core_type = #tpu.core_type<tc>, window_params = [{pipeline_mode = #tpu.pipeline_mode<synchronous>, transform_indices = @transform_0, window_bounds = array<i64: 8, 128>}, {pipeline_mode = #tpu.pipeline_mode<synchronous>, transform_indices = @transform_1, window_bounds = array<i64: 8, 128>}]} {
    %c0 = arith.constant 0 : index
    %c0_0 = arith.constant 0 : index
    %0 = vector.load %arg1[%c0, %c0_0] : memref<8x128xf32, #tpu.memory_space<vmem>>, vector<8x128xf32>
    %cst = arith.constant 0.000000e+00 : f32
    %1 = vector.broadcast %cst : f32 to vector<8x128xf32>
    %2 = arith.addf %0, %1 : vector<8x128xf32>
    %c0_1 = arith.constant 0 : index
    %c0_2 = arith.constant 0 : index
    %3 = vector.load %arg2[%c0_1, %c0_2] : memref<8x128xf32, #tpu.memory_space<vmem>>, vector<8x128xf32>
    tpu.vector_store %arg2[%c0_1, %c0_2], %2 {strides = array<i32>} : memref<8x128xf32, #tpu.memory_space<vmem>>, vector<8x128xf32>,
    return
  }
  func.func @transform_0(%arg0: i32) -> (i32, i32) {
    %c0_i32 = arith.constant 0 : i32
    %c0_i32_0 = arith.constant 0 : i32
    %c0_i32_1 = arith.constant 0 : i32
    return %c0_i32, %c0_i32_0 : i32, i32
  }
  func.func @transform_1(%arg0: i32) -> (i32, i32) {
    %c0_i32 = arith.constant 0 : i32
    %c0_i32_0 = arith.constant 0 : i32
    %c0_i32_1 = arith.constant 0 : i32
    return %c0_i32, %c0_i32_0 : i32, i32
  }
}

module attributes {stable_mosaic.version = 11 : i64} {
  func.func @_concat_kernel(%arg0: i32, %arg1: memref<128x256xbf16, #tpu.memory_space<vmem>>, %arg2: memref<256x128xbf16, #tpu.memory_space<vmem>>, %arg3: memref<1x128xf32, #tpu.memory_space<vmem>>, %arg4: memref<8x128xbf16, #tpu.memory_space<vmem>>, %arg5: memref<8x128xbf16, #tpu.memory_space<vmem>>, %arg6: memref<128x128xbf16, #tpu.memory_space<vmem>>, %arg7: memref<128x128xbf16, #tpu.memory_space<vmem>>, %arg8: memref<1x128xf32, #tpu.memory_space<vmem>>, %arg9: memref<8x128xf32, #tpu.memory_space<vmem>>, %arg10: memref<8x128xf32, #tpu.memory_space<vmem>>, %arg11: memref<8x128xf32, #tpu.memory_space<vmem>>) attributes {dimension_semantics = [#tpu.dimension_semantics<arbitrary>], iteration_bounds = array<i64: 2>, scalar_prefetch = 0 : i64, scratch_operands = 2 : i64, tpu.core_type = #tpu.core_type<tc>, window_params = [{transform_indices = @transform_0, window_bounds = array<i64: 128, 256>}, {pipeline_mode = #tpu.pipeline_mode<synchronous>, transform_indices = @transform_1, window_bounds = array<i64: 256, 128>}, {pipeline_mode = #tpu.pipeline_mode<synchronous>, transform_indices = @transform_2, window_bounds = array<i64: 1, 128>}, {transform_indices = @transform_3, window_bounds = array<i64: 8, 128>}, {transform_indices = @transform_4, window_bounds = array<i64: 8, 128>}, {pipeline_mode = #tpu.pipeline_mode<synchronous>, transform_indices = @transform_5, window_bounds = array<i64: 128, 128>}, {pipeline_mode = #tpu.pipeline_mode<synchronous>, transform_indices = @transform_6, window_bounds = array<i64: 128, 128>}, {pipeline_mode = #tpu.pipeline_mode<synchronous>, transform_indices = @transform_7, window_bounds = array<i64: 1, 128>}, {pipeline_mode = #tpu.pipeline_mode<synchronous>, transform_indices = @transform_8, window_bounds = array<i64: 8, 128>}]} {
    %c0_i32 = arith.constant 0 : i32
    %0 = arith.cmpi eq, %arg0, %c0_i32 : i32
    %1 = arith.extui %0 : i1 to i32
    %c0_i32_0 = arith.constant 0 : i32
    %2 = arith.cmpi ne, %1, %c0_i32_0 : i32
    scf.if %2 {
      %cst_22 = arith.constant 0.000000e+00 : f32
      %25 = vector.broadcast %cst_22 : f32 to vector<8x128xf32>
      %c0_23 = arith.constant 0 : index
      %c0_24 = arith.constant 0 : index
      %26 = vector.load %arg10[%c0_23, %c0_24] : memref<8x128xf32, #tpu.memory_space<vmem>>, vector<8x128xf32>
      tpu.vector_store %arg10[%c0_23, %c0_24], %25 {strides = array<i32>} : memref<8x128xf32, #tpu.memory_space<vmem>>, vector<8x128xf32>,
      %cst_25 = arith.constant 0.000000e+00 : f32
      %27 = vector.broadcast %cst_25 : f32 to vector<8x128xf32>
      %c0_26 = arith.constant 0 : index
      %c0_27 = arith.constant 0 : index
      %28 = vector.load %arg11[%c0_26, %c0_27] : memref<8x128xf32, #tpu.memory_space<vmem>>, vector<8x128xf32>
      tpu.vector_store %arg11[%c0_26, %c0_27], %27 {strides = array<i32>} : memref<8x128xf32, #tpu.memory_space<vmem>>, vector<8x128xf32>,
    } else {
    }
    %c0 = arith.constant 0 : index
    %c0_1 = arith.constant 0 : index
    %3 = vector.load %arg1[%c0, %c0_1] : memref<128x256xbf16, #tpu.memory_space<vmem>>, vector<128x256xbf16>
    %c0_2 = arith.constant 0 : index
    %c0_3 = arith.constant 0 : index
    %4 = vector.load %arg2[%c0_2, %c0_3] : memref<256x128xbf16, #tpu.memory_space<vmem>>, vector<256x128xbf16>
    %cst = arith.constant dense<0.000000e+00> : vector<128x128xf32>
    %5 = tpu.matmul %3, %4, %cst {dimension_numbers = #tpu.dot_dimension_numbers<[1], [0], [0], [1], [0, 0, 1, 1], [], []>} : vector<128x256xbf16>, vector<256x128xbf16>, vector<128x128xf32> -> vector<128x128xf32>
    %c0_4 = arith.constant 0 : index
    %c0_5 = arith.constant 0 : index
    %6 = vector.load %arg3[%c0_4, %c0_5] : memref<1x128xf32, #tpu.memory_space<vmem>>, vector<1x128xf32>
    %7 = vector.broadcast %6 : vector<1x128xf32> to vector<128x128xf32>
    %8 = arith.addf %5, %7 : vector<128x128xf32>
    %cst_6 = arith.constant 0.000000e+00 : f32
    %9 = vector.broadcast %cst_6 : f32 to vector<128x128xf32>
    %10 = arith.maximumf %8, %9 : vector<128x128xf32>
    %11 = arith.truncf %10 : vector<128x128xf32> to vector<128x128xbf16>
    %c0_7 = arith.constant 0 : index
    %c0_8 = arith.constant 0 : index
    %12 = vector.load %arg10[%c0_7, %c0_8] : memref<8x128xf32, #tpu.memory_space<vmem>>, vector<8x128xf32>
    %c0_9 = arith.constant 0 : index
    %c0_10 = arith.constant 0 : index
    %13 = vector.load %arg4[%c0_9, %c0_10] : memref<8x128xbf16, #tpu.memory_space<vmem>>, vector<8x128xbf16>
    %cst_11 = arith.constant dense<0.000000e+00> : vector<8x128xf32>
    %14 = tpu.matmul %13, %11, %cst_11 {dimension_numbers = #tpu.dot_dimension_numbers<[1], [0], [0], [1], [0, 0, 1, 1], [], []>} : vector<8x128xbf16>, vector<128x128xbf16>, vector<8x128xf32> -> vector<8x128xf32>
    %15 = arith.addf %12, %14 : vector<8x128xf32>
    %c0_12 = arith.constant 0 : index
    %c0_13 = arith.constant 0 : index
    %16 = vector.load %arg10[%c0_12, %c0_13] : memref<8x128xf32, #tpu.memory_space<vmem>>, vector<8x128xf32>
    tpu.vector_store %arg10[%c0_12, %c0_13], %15 {strides = array<i32>} : memref<8x128xf32, #tpu.memory_space<vmem>>, vector<8x128xf32>,
    %c0_14 = arith.constant 0 : index
    %c0_15 = arith.constant 0 : index
    %17 = vector.load %arg11[%c0_14, %c0_15] : memref<8x128xf32, #tpu.memory_space<vmem>>, vector<8x128xf32>
    %c0_16 = arith.constant 0 : index
    %c0_17 = arith.constant 0 : index
    %18 = vector.load %arg5[%c0_16, %c0_17] : memref<8x128xbf16, #tpu.memory_space<vmem>>, vector<8x128xbf16>
    %cst_18 = arith.constant dense<0.000000e+00> : vector<8x128xf32>
    %19 = tpu.matmul %18, %11, %cst_18 {dimension_numbers = #tpu.dot_dimension_numbers<[1], [0], [0], [1], [0, 0, 1, 1], [], []>} : vector<8x128xbf16>, vector<128x128xbf16>, vector<8x128xf32> -> vector<8x128xf32>
    %20 = arith.addf %17, %19 : vector<8x128xf32>
    %c0_19 = arith.constant 0 : index
    %c0_20 = arith.constant 0 : index
    %21 = vector.load %arg11[%c0_19, %c0_20] : memref<8x128xf32, #tpu.memory_space<vmem>>, vector<8x128xf32>
    tpu.vector_store %arg11[%c0_19, %c0_20], %20 {strides = array<i32>} : memref<8x128xf32, #tpu.memory_space<vmem>>, vector<8x128xf32>,
    %c1_i32 = arith.constant 1 : i32
    %22 = arith.cmpi eq, %arg0, %c1_i32 : i32
    %23 = arith.extui %22 : i1 to i32
    %c0_i32_21 = arith.constant 0 : i32
    %24 = arith.cmpi ne, %23, %c0_i32_21 : i32
    scf.if %24 {
      %c0_22 = arith.constant 0 : index
      %c0_23 = arith.constant 0 : index
      %25 = vector.load %arg10[%c0_22, %c0_23] : memref<8x128xf32, #tpu.memory_space<vmem>>, vector<8x128xf32>
      %26 = arith.truncf %25 : vector<8x128xf32> to vector<8x128xbf16>
      %c0_24 = arith.constant 0 : index
      %c0_25 = arith.constant 0 : index
      %27 = vector.load %arg6[%c0_24, %c0_25] : memref<128x128xbf16, #tpu.memory_space<vmem>>, vector<128x128xbf16>
      %cst_26 = arith.constant dense<0.000000e+00> : vector<8x128xf32>
      %28 = tpu.matmul %26, %27, %cst_26 {dimension_numbers = #tpu.dot_dimension_numbers<[1], [0], [0], [1], [0, 0, 1, 1], [], []>} : vector<8x128xbf16>, vector<128x128xbf16>, vector<8x128xf32> -> vector<8x128xf32>
      %c0_27 = arith.constant 0 : index
      %c0_28 = arith.constant 0 : index
      %29 = vector.load %arg11[%c0_27, %c0_28] : memref<8x128xf32, #tpu.memory_space<vmem>>, vector<8x128xf32>
      %30 = arith.truncf %29 : vector<8x128xf32> to vector<8x128xbf16>
      %c0_29 = arith.constant 0 : index
      %c0_30 = arith.constant 0 : index
      %31 = vector.load %arg7[%c0_29, %c0_30] : memref<128x128xbf16, #tpu.memory_space<vmem>>, vector<128x128xbf16>
      %cst_31 = arith.constant dense<0.000000e+00> : vector<8x128xf32>
      %32 = tpu.matmul %30, %31, %cst_31 {dimension_numbers = #tpu.dot_dimension_numbers<[1], [0], [0], [1], [0, 0, 1, 1], [], []>} : vector<8x128xbf16>, vector<128x128xbf16>, vector<8x128xf32> -> vector<8x128xf32>
      %33 = arith.addf %28, %32 : vector<8x128xf32>
      %c0_32 = arith.constant 0 : index
      %c0_33 = arith.constant 0 : index
      %34 = vector.load %arg8[%c0_32, %c0_33] : memref<1x128xf32, #tpu.memory_space<vmem>>, vector<1x128xf32>
      %35 = vector.broadcast %34 : vector<1x128xf32> to vector<8x128xf32>
      %36 = arith.addf %33, %35 : vector<8x128xf32>
      %c0_34 = arith.constant 0 : index
      %c0_35 = arith.constant 0 : index
      %37 = vector.load %arg9[%c0_34, %c0_35] : memref<8x128xf32, #tpu.memory_space<vmem>>, vector<8x128xf32>
      tpu.vector_store %arg9[%c0_34, %c0_35], %36 {strides = array<i32>} : memref<8x128xf32, #tpu.memory_space<vmem>>, vector<8x128xf32>,
    } else {
    }
    return
  }
  func.func @transform_0(%arg0: i32) -> (i32, i32) {
    %c0_i32 = arith.constant 0 : i32
    %c0_i32_0 = arith.constant 0 : i32
    return %arg0, %c0_i32 : i32, i32
  }
  func.func @transform_1(%arg0: i32) -> (i32, i32) {
    %c0_i32 = arith.constant 0 : i32
    %c0_i32_0 = arith.constant 0 : i32
    %c0_i32_1 = arith.constant 0 : i32
    return %c0_i32, %c0_i32_0 : i32, i32
  }
  func.func @transform_2(%arg0: i32) -> (i32, i32) {
    %c0_i32 = arith.constant 0 : i32
    %c0_i32_0 = arith.constant 0 : i32
    %c0_i32_1 = arith.constant 0 : i32
    return %c0_i32, %c0_i32_0 : i32, i32
  }
  func.func @transform_3(%arg0: i32) -> (i32, i32) {
    %c0_i32 = arith.constant 0 : i32
    %c0_i32_0 = arith.constant 0 : i32
    return %c0_i32, %arg0 : i32, i32
  }
  func.func @transform_4(%arg0: i32) -> (i32, i32) {
    %c0_i32 = arith.constant 0 : i32
    %c0_i32_0 = arith.constant 0 : i32
    return %c0_i32, %arg0 : i32, i32
  }
  func.func @transform_5(%arg0: i32) -> (i32, i32) {
    %c0_i32 = arith.constant 0 : i32
    %c0_i32_0 = arith.constant 0 : i32
    %c0_i32_1 = arith.constant 0 : i32
    return %c0_i32, %c0_i32_0 : i32, i32
  }
  func.func @transform_6(%arg0: i32) -> (i32, i32) {
    %c0_i32 = arith.constant 0 : i32
    %c0_i32_0 = arith.constant 0 : i32
    %c0_i32_1 = arith.constant 0 : i32
    return %c0_i32, %c0_i32_0 : i32, i32
  }
  func.func @transform_7(%arg0: i32) -> (i32, i32) {
    %c0_i32 = arith.constant 0 : i32
    %c0_i32_0 = arith.constant 0 : i32
    %c0_i32_1 = arith.constant 0 : i32
    return %c0_i32, %c0_i32_0 : i32, i32
  }
  func.func @transform_8(%arg0: i32) -> (i32, i32) {
    %c0_i32 = arith.constant 0 : i32
    %c0_i32_0 = arith.constant 0 : i32
    %c0_i32_1 = arith.constant 0 : i32
    return %c0_i32, %c0_i32_0 : i32, i32
  }
}

</mosaic_0001>

<bundles_post_ra>
// kernel: tpu_custom_call.1
= control target key start
LH: loop header
LB: loop body
LE: loop exit
PB: predicated region body
PF: predicated region fallthrough
CT: control target
= control target key end

     0   :  { %6 = vsyncpa [#allocation3], 0  ;;  %s305_s0 = inlined_call_operand.hbm [shape: f32[8,128], index: 0, kind: input, shape index: {}]   ;;  %s306_s1 = inlined_call_operand.hbm [shape: f32[8,128], index: 1, kind: output, shape index: {}]  }
   0x1   :  { %7 = vsyncpa [#allocation4], 0  ;;  %s258_s6 = smov 0  }
   0x2 LB: > { %s145_s7 = sadd.s32 4294967295, %s244_s6   ;;  %p146_p0 = scmp.ge.s32.totalorder %s244_s6, 1  ;;  %s244_s6 = sphi %s258_s6, %s13_s6  }
   0x3   : > { %p60_p1 = scmp.lt.s32.totalorder %s244_s6, 3  ;;  %p270_p3 = scmp.eq.s32.totalorder %s145_s7, 0 }
   0x4   : > { %s246_s10 = smov [#allocation2]  }
   0x5   : > { %p266_p2 = pnand %p146_p0, %p60_p1  ;;  %s73_s11 = sshll.u32 %s246_s10, 4  ;;  %s74_s11 = int_to_ptr.vmem [resolvable:$true] %s73_s11 }
   0x6   : > { %s191_s12 = scalar_lea.vmem %s74_s11, 128  ;;  %p199_p10 = scmp.lt.s32.totalorder %s74_s11, %s74_s11 }
   0x7   : > { %p162_p4 = pneg %p266_p2  ;;  %p192_p7 = scmp.ne.s32.totalorder %s74_s11, %s191_s12 }
   0x8   : > { %p200_p11 = scmp.lt.s32.totalorder %s191_s12, %s191_s12 }
   0x9   : > { %p163_p5 = pnand %p270_p3, %p162_p4 }
   0xa   : > { %p201_p12 = por %p200_p11, %p199_p10 }
   0xb   : > { %p182_p6 = pneg %p163_p5 }
   0xd   : > { %p194_p8 = pnand %p192_p7, %p182_p6 }
   0xf   : > { %p195_p9 = pneg %p194_p8 }
  0x11   : > { %p202_p13 = pnand %p201_p12, %p195_p9 }
  0x13   : > { %205 = shalt.err (!%p202_p13)
}
  0x14   : > { %165 = dma.hbm_to_vmem [thread:$0]  (!%p163_p5), %s305_s0, 128, %s74_s11, [#allocation3]  }
  0x15   : > { %86 = sbr.rel (%p266_p2) target bundleno = 42 (0x2a), region = 24 }
  0x1a   : > { %235 = dma.done.wait (%p270_p3), [#allocation3], 128  }
  0x1b   : > { %237 = vsyncadd (%p270_p3), [#allocation3], 4294967168  ;;  %s247_s15 = smov [#allocation5]   ;;  %p287_p0 = scmp.eq.s32.totalorder %s145_s7, 1  ;;  %v96_v0 = vld [vmem:[#allocation2] sm:$0xff] }
  0x1c   : > { %s106_s16 = sshll.u32 %s247_s15, 4  ;;  %98 = vst [vmem:[#allocation5] sm:$0xff] %v96_v0  ;;  %s107_s16 = int_to_ptr.vmem [resolvable:$true] %s106_s16 }
  0x1d   : > { %s206_s18 = scalar_lea.vmem %s107_s16, 128  ;;  %p213_p5 = scmp.lt.s32.totalorder %s107_s16, %s107_s16 }
  0x1e   : > { %p207_p1 = scmp.ne.s32.totalorder %s107_s16, %s206_s18  ;;  %p214_p6 = scmp.lt.s32.totalorder %s206_s18, %s206_s18 }
  0x20   : > { %p208_p2 = pnand %p207_p1, %p287_p0  ;;  %p215_p7 = por %p214_p6, %p213_p5 }
  0x22   : > { %p209_p4 = pneg %p208_p2 }
  0x24   : > { %p216_p8 = pnand %p215_p7, %p209_p4 }
  0x26   : > { %219 = shalt.err (!%p216_p8)
}
  0x27   : > { %159 = dma.vmem_to_hbm [thread:$0]  (%p287_p0), %s107_s16, 128, %s306_s1, [#allocation4]  }
  0x28   : > { %239 = dma.done.wait (%p287_p0), [#allocation4], 128  }
  0x29   : > { %241 = vsyncadd (%p287_p0), [#allocation4], 4294967168 }
  0x2a PF: > { %s13_s6 = sadd.s32 1, %s244_s6  }
  0x2b   : > { %p10_p3 = scmp.ge.s32.totalorder %s13_s6, 4  }
  0x2d   :  { %12 = sbr.rel (!%p10_p3) target bundleno = 2 (0x2), region = 53 }
  0x32   :  { %119 = vsyncpa [#allocation3], 1 }
  0x33   :  { %121 = vsyncpa [#allocation3 + $0x1], 1 }
  0x34   :  { %122 = vsyncpa [#allocation4], 1 }
  0x35   :  { %124 = vsyncpa [#allocation4 + $0x1], 1 }

// kernel: _ppi_forward.1
= control target key start
LH: loop header
LB: loop body
LE: loop exit
PB: predicated region body
PF: predicated region fallthrough
CT: control target
= control target key end

     0   :  { %s1425_s27 = smov 0   ;;  %s1630_s0 = inlined_call_operand.vmem [shape: bf16[256,256], index: 0, kind: input, shape index: {}]   ;;  %s1631_s1 = inlined_call_operand.vmem [shape: bf16[256,128], index: 1, kind: input, shape index: {}]   ;;  %s1632_s2 = inlined_call_operand.vmem [shape: f32[1,128], index: 2, kind: input, shape index: {}]   ;;  %s1633_s3 = inlined_call_operand.vmem [shape: bf16[8,256], index: 3, kind: input, shape index: {}]   ;;  %s1634_s4 = inlined_call_operand.vmem [shape: bf16[8,256], index: 4, kind: input, shape index: {}]   ;;  %s1635_s5 = inlined_call_operand.vmem [shape: bf16[128,128], index: 5, kind: input, shape index: {}]   ;;  %s1636_s6 = inlined_call_operand.vmem [shape: bf16[128,128], index: 6, kind: input, shape index: {}]   ;;  %s1637_s7 = inlined_call_operand.vmem [shape: f32[1,128], index: 7, kind: input, shape index: {}]   ;;  %s1638_s8 = inlined_call_operand.vmem [shape: f32[8,128], index: 8, kind: output, shape index: {}]  }
   0x1 LB: > { %s1431_s28 = sadd.s32 4294967295, %s1373_s27   ;;  %p1057_p0 = scmp.ge.s32.totalorder %s1373_s27, 1  ;;  %s1373_s27 = sphi %s1425_s27, %s18_s27  }
   0x2   : > { %p277_p1 = scmp.lt.s32.totalorder %s1373_s27, 3 }
   0x4   : > { %p278_p2 = pnand %p1057_p0, %p277_p1 }
   0x5   : > { %s1058_s29 = sshll.u32 (!%p278_p2), %s1431_s28, 4  ;;  %p322_p3 = scmp.lt.s32.totalorder (!%p278_p2), %s1431_s28, 1 }
   0x6   : > { %281 = sbr.rel (%p278_p2) target bundleno = 810 (0x32a), region = 52  ;;  %p316_p4 = scmp.lt.s32.totalorder (!%p278_p2), %s1058_s29, 31 }
   0x7   : > { %p1063_p5 = scmp.ne.s32.totalorder (!%p278_p2), %s1431_s28, 0 }
   0xb   : > { %s323_s30 = scalar_select %p322_p3, %s1431_s28, 1 }
   0xc   : > { %s1640_s29 = smov (!%p316_p4, %s1058_s29), 31  ;;  %334 = sbr.rel (%p1063_p5) target bundleno = 19 (0x13), region = 56 }
   0xd   : > { %s1061_s9 = sshll.u32 %s323_s30, 2  ;;  %s1117_s10 = sshll.u32 %s1640_s29, 3 }
   0xe   : > { %s1441_s13 = scalar_lea.vmem %s1633_s3, %s1061_s9  ;;  %s1446_s16 = scalar_lea.vmem %s1630_s0, %s1117_s10 }
   0xf   : > { %s1451_s19 = scalar_lea.vmem %s1634_s4, %s1061_s9 }
  0x11   : > { %v1375_v0 = vmov 0.0  }
  0x12   : > { %335 = vst [vmem:[#allocation2] sm:$0xff] %v1375_v0  ;;  %336 = vst [vmem:[#allocation3] sm:$0xff] %v1375_v0 }
  0x13 PF: > { %v1311_v1 = vld [vmem:[%s1631_s1 + $0x78] sm:$0xff]   ;;  %v1313_v3 = vld [vmem:[%s1631_s1 + $0x70] sm:$0xff]   ;;  %v1315_v5 = vld [vmem:[%s1631_s1 + $0x68] sm:$0xff]   ;;  %v1376_v33 = vmov 0.0   ;;  %vm1377_vm0 = vmmov 0   ;;  %p1097_p6 = scmp.ne.s32.totalorder %s1431_s28, 1 }
  0x14   : > { %v1312_v2 = vld [vmem:[%s1631_s1 + $0x38] sm:$0xff]   ;;  %1118 = vmatprep.subr.bf16.mxu0 %v1311_v1  ;;  %v1314_v4 = vld [vmem:[%s1631_s1 + $0x30] sm:$0xff]   ;;  %v1316_v6 = vld [vmem:[%s1631_s1 + $0x28] sm:$0xff]   ;;  %1218 = vmatprep.subr.bf16.mxu1 %v1376_v33 }
  0x15   : > { %1119 = vmatpush3.bf16.msra.mxu0 %v1312_v2  ;;  %v1317_v7 = vld [vmem:[%s1631_s1 + $0x60] sm:$0xff]   ;;  %v1319_v9 = vld [vmem:[%s1631_s1 + $0x58] sm:$0xff]   ;;  %v1321_v11 = vld [vmem:[%s1631_s1 + $0x50] sm:$0xff]   ;;  %1234 = vmatprep.mubr.msk.bf16.mxu1 %vm1377_vm0, %v1376_v33 }
  0x16   : > { %1120 = vmatprep.subr.bf16.mxu0 %v1313_v3  ;;  %v1318_v8 = vld [vmem:[%s1631_s1 + $0x20] sm:$0xff]   ;;  %v1320_v10 = vld [vmem:[%s1631_s1 + $0x18] sm:$0xff]   ;;  %v1322_v13 = vld [vmem:[%s1631_s1 + $0x10] sm:$0xff]  }
  0x17   : > { %v1329_v12 = vld [vmem:[%s1446_s16 + $0x4] ss:$8 sps:$4 sm:$0xff]   ;;  %v1327_v18 = vld [vmem:[%s1446_s16] ss:$8 sps:$4 sm:$0xff]   ;;  %v1330_v19 = vld [vmem:[%s1446_s16 + $0x14] ss:$8 sps:$4 sm:$0xff]  }
  0x18   : > { %600 = vmatprep.mubr.bf16.mxu0 %v1329_v12  ;;  %v1323_v14 = vld [vmem:[%s1631_s1 + $0x48] sm:$0xff]   ;;  %v1325_v16 = vld [vmem:[%s1631_s1 + $0x40] sm:$0xff]   ;;  %v1332_v20 = vld [vmem:[%s1446_s16 + $0x10] ss:$8 sps:$4 sm:$0xff]  }
  0x19   : > { %1121 = vmatpush3.bf16.msra.mxu0 %v1314_v4  ;;  %v1324_v15 = vld [vmem:[%s1631_s1 + $0x8] sm:$0xff]   ;;  %v1326_v17 = vld [vmem:[%s1631_s1] sm:$0xff]   ;;  %v1336_v23 = vld [vmem:[%s1446_s16 + $0x34] ss:$8 sps:$4 sm:$0xff]  }
  0x1a   : > { %1122 = vmatprep.subr.bf16.mxu0 %v1315_v5  ;;  %v1333_v21 = vld [vmem:[%s1446_s16 + $0x24] ss:$8 sps:$4 sm:$0xff]   ;;  %v1335_v22 = vld [vmem:[%s1446_s16 + $0x20] ss:$8 sps:$4 sm:$0xff]   ;;  %v1338_v24 = vld [vmem:[%s1446_s16 + $0x30] ss:$8 sps:$4 sm:$0xff]  }
  0x1b   : > { %v1339_v25 = vld [vmem:[%s1446_s16 + $0x44] ss:$8 sps:$4 sm:$0xff]   ;;  %v1341_v26 = vld [vmem:[%s1446_s16 + $0x40] ss:$8 sps:$4 sm:$0xff]   ;;  %v1342_v27 = vld [vmem:[%s1446_s16 + $0x54] ss:$8 sps:$4 sm:$0xff]  }
  0x1c   : > { %v1344_v28 = vld [vmem:[%s1446_s16 + $0x50] ss:$8 sps:$4 sm:$0xff]   ;;  %v1345_v29 = vld [vmem:[%s1446_s16 + $0x64] ss:$8 sps:$4 sm:$0xff]   ;;  %v1347_v30 = vld [vmem:[%s1446_s16 + $0x60] ss:$8 sps:$4 sm:$0xff]  }
  0x1d   : > { %1123 = vmatpush3.bf16.msra.mxu0 %v1316_v6  ;;  %v1348_v31 = vld [vmem:[%s1446_s16 + $0x74] ss:$8 sps:$4 sm:$0xff]   ;;  %v1350_v32 = vld [vmem:[%s1446_s16 + $0x70] ss:$8 sps:$4 sm:$0xff]   ;;  %v1524_v37 = vld [vmem:[%s1632_s2] ss:$0 sm:$0xff] }
  0x1e   : > { %1124 = vmatprep.subr.bf16.mxu0 %v1317_v7 }
  0x21   : > { %1125 = vmatpush3.bf16.msra.mxu0 %v1318_v8 }
  0x22   : > { %1126 = vmatprep.subr.bf16.mxu0 %v1319_v9 }
  0x25   : > { %1127 = vmatpush3.bf16.msra.mxu0 %v1320_v10 }
  0x26   : > { %1128 = vmatprep.subr.bf16.mxu0 %v1321_v11 }
  0x29   : > { %1129 = vmatpush3.bf16.msra.mxu0 %v1322_v13 }
  0x2a   : > { %1130 = vmatprep.subr.bf16.mxu0 %v1323_v14 }
  0x2d   : > { %1131 = vmatpush3.bf16.msra.mxu0 %v1324_v15 }
  0x2e   : > { %1132 = vmatprep.subr.bf16.mxu0 %v1325_v16 }
  0x31   : > { %1133 = vmatpush3.bf16.msra.mxu0 %v1326_v17 }
  0x34   : > { %601 = vmatmul.mubr.bf16.vlgmr.msra.gmra.mxu0 %v1327_v18 }
  0x35   : > { %608 = vmatprep.mubr.bf16.mxu0 %v1330_v19 }
  0x3c   : > { %609 = vmatmul.mubr.bf16.gmra.mxu0 %v1332_v20 }
  0x3d   : > { %616 = vmatprep.mubr.bf16.mxu0 %v1333_v21 }
  0x44   : > { %617 = vmatmul.mubr.bf16.gmra.mxu0 %v1335_v22 }
  0x45   : > { %624 = vmatprep.mubr.bf16.mxu0 %v1336_v23 }
  0x4c   : > { %625 = vmatmul.mubr.bf16.gmra.mxu0 %v1338_v24 }
  0x4d   : > { %632 = vmatprep.mubr.bf16.mxu0 %v1339_v25 }
  0x54   : > { %633 = vmatmul.mubr.bf16.gmra.mxu0 %v1341_v26 }
  0x55   : > { %640 = vmatprep.mubr.bf16.mxu0 %v1342_v27 }
  0x5c   : > { %641 = vmatmul.mubr.bf16.gmra.mxu0 %v1344_v28 }
  0x5d   : > { %648 = vmatprep.mubr.bf16.mxu0 %v1345_v29 }
  0x64   : > { %649 = vmatmul.mubr.bf16.gmra.mxu0 %v1347_v30 }
  0x65   : > { %656 = vmatprep.mubr.bf16.mxu0 %v1348_v31 }
  0x6c   : > { %657 = vmatmul.mubr.bf16.gmra.mxu0 %v1350_v32 }
  0xf4   : > { %v1134_v34 = vpop.f32.mrf.mxu0 }
  0xf6   : > { %v1135_v35 = vpop.f32.mrf.mxu0 }
  0xf7   : > { %v1136_v36 = vadd.f32 %v1135_v35, %v1134_v34 }
  0xf8   : > { %v1137_v38 = vpop.f32.mrf.mxu0 }
  0xf9   : > { %v603_v40 = vadd.f32 %v1136_v36, %v1524_v37 }
  0xfa   : > { %v1138_v39 = vpop.f32.mrf.mxu0 }
  0xfb   : > { %v1139_v41 = vadd.f32 %v1138_v39, %v1137_v38  ;;  %v665_v45 = vmax.f32 %v603_v40, 0.0 }
  0xfc   : > { %v1140_v42 = vpop.f32.mrf.mxu0 }
  0xfd   : > { %v606_v43 = vadd.f32 %v1139_v41, %v1524_v37 }
  0xfe   : > { %v1141_v44 = vpop.f32.mrf.mxu0 }
  0xff   : > { %v666_v46 = vmax.f32 %v606_v43, 0.0  ;;  %v1142_v47 = vadd.f32 %v1141_v44, %v1140_v42 }
 0x100   : > { %v1143_v48 = vpop.f32.mrf.mxu0 }
 0x101   : > { %v1528_v49 = vpack.c.bf16 %v666_v46, %v665_v45  ;;  %v611_v51 = vadd.f32 %v1142_v47, %v1524_v37 }
 0x102   : > { %v1144_v50 = vpop.f32.mrf.mxu0 }
 0x103   : > { %v1145_v52 = vadd.f32 %v1144_v50, %v1143_v48  ;;  %v667_v56 = vmax.f32 %v611_v51, 0.0 }
 0x104   : > { %v1146_v53 = vpop.f32.mrf.mxu0 }
 0x105   : > { %v614_v54 = vadd.f32 %v1145_v52, %v1524_v37 }
 0x106   : > { %v1147_v55 = vpop.f32.mrf.mxu0 }
 0x107   : > { %v668_v57 = vmax.f32 %v614_v54, 0.0  ;;  %v1532_v58 = vadd.f32 %v1147_v55, %v1146_v53 }
 0x108   : > { %v1149_v59 = vpop.f32.mrf.mxu0 }
 0x109   : > { %v1534_v60 = vpack.c.bf16 %v668_v57, %v667_v56  ;;  %v619_v56 = vadd.f32 %v1532_v58, %v1524_v37  ;;  %v734_v58 = vld [vmem:[%s1451_s19] sm:$0xf] }
 0x10a   : > { %v1150_v61 = vpop.f32.mrf.mxu0 }
 0x10b   : > { %v1151_v46 = vadd.f32 %v1150_v61, %v1149_v59 }
 0x10c   : > { %v1152_v62 = vpop.f32.mrf.mxu0 }
 0x10d   : > { %v622_v53 = vadd.f32 %v1151_v46, %v1524_v37 }
 0x10e   : > { %v1153_v63 = vpop.f32.mrf.mxu0 }
 0x10f   : > { %v1154_v43 = vadd.f32 %v1153_v63, %v1152_v62  ;;  %v670_v59 = vmax.f32 %v622_v53, 0.0  ;;  %v669_v62 = vmax.f32 %v619_v56, 0.0 }
 0x110   : > { %v1155_v0 = vpop.f32.mrf.mxu0 }
 0x111   : > { %v627_v51 = vadd.f32 %v1154_v43, %v1524_v37  ;;  %v683_v63 = vpack.c.bf16 %v670_v59, %v669_v62 }
 0x112   : > { %v1156_v1 = vpop.f32.mrf.mxu0 }
 0x113   : > { %v1157_v39 = vadd.f32 %v1156_v1, %v1155_v0  ;;  %v671_v57 = vmax.f32 %v627_v51, 0.0  ;;  %v689_v0 = vld [vmem:[#allocation2] sm:$0xff] }
 0x114   : > { %v1158_v2 = vpop.f32.mrf.mxu0 }
 0x115   : > { %v630_v47 = vadd.f32 %v1157_v39, %v1524_v37 }
 0x116   : > { %v1159_v3 = vpop.f32.mrf.mxu0 }
 0x117   : > { %v1160_v35 = vadd.f32 %v1159_v3, %v1158_v2  ;;  %v672_v54 = vmax.f32 %v630_v47, 0.0 }
 0x118   : > { %v1161_v4 = vpop.f32.mrf.mxu0 }
 0x119   : > { %v635_v44 = vadd.f32 %v1160_v35, %v1524_v37  ;;  %v684_v61 = vpack.c.bf16 %v672_v54, %v671_v57 }
 0x11a   : > { %v1162_v5 = vpop.f32.mrf.mxu0 }
 0x11b   : > { %v1163_v30 = vadd.f32 %v1162_v5, %v1161_v4  ;;  %v673_v52 = vmax.f32 %v635_v44, 0.0 }
 0x11c   : > { %v1164_v6 = vpop.f32.mrf.mxu0 }
 0x11d   : > { %v638_v40 = vadd.f32 %v1163_v30, %v1524_v37 }
 0x11e   : > { %v1165_v7 = vpop.f32.mrf.mxu0 }
 0x11f   : > { %v1166_v26 = vadd.f32 %v1165_v7, %v1164_v6  ;;  %v674_v48 = vmax.f32 %v638_v40, 0.0  ;;  %v733_v6 = vld [vmem:[#allocation3] sm:$0xff] }
 0x120   : > { %v1167_v8 = vpop.f32.mrf.mxu0 }
 0x121   : > { %v643_v36 = vadd.f32 %v1166_v26, %v1524_v37  ;;  %v685_v55 = vpack.c.bf16 %v674_v48, %v673_v52 }
 0x122   : > { %v1168_v9 = vpop.f32.mrf.mxu0 }
 0x123   : > { %v1169_v23 = vadd.f32 %v1168_v9, %v1167_v8  ;;  %v675_v45 = vmax.f32 %v643_v36, 0.0 }
 0x124   : > { %v1170_v10 = vpop.f32.mrf.mxu0 }
 0x125   : > { %v646_v31 = vadd.f32 %v1169_v23, %v1524_v37 }
 0x126   : > { %v1171_v11 = vpop.f32.mrf.mxu0 }
 0x127   : > { %v1172_v20 = vadd.f32 %v1171_v11, %v1170_v10  ;;  %v676_v41 = vmax.f32 %v646_v31, 0.0 }
 0x128   : > { %v1173_v12 = vpop.f32.mrf.mxu0 }
 0x129   : > { %v651_v27 = vadd.f32 %v1172_v20, %v1524_v37  ;;  %v686_v50 = vpack.c.bf16 %v676_v41, %v675_v45 }
 0x12a   : > { %v1174_v13 = vpop.f32.mrf.mxu0 }
 0x12b   : > { %v1175_v18 = vadd.f32 %v1174_v13, %v1173_v12  ;;  %v677_v38 = vmax.f32 %v651_v27, 0.0 }
 0x12c   : > { %v1176_v14 = vpop.f32.mrf.mxu0 }
 0x12d   : > { %v654_v24 = vadd.f32 %v1175_v18, %v1524_v37 }
 0x12e   : > { %v1177_v15 = vpop.f32.mrf.mxu0 }
 0x12f   : > { %v1178_v16 = vadd.f32 %v1177_v15, %v1176_v14  ;;  %v678_v32 = vmax.f32 %v654_v24, 0.0 }
 0x130   : > { %v1179_v17 = vpop.f32.mrf.mxu0 }
 0x131   : > { %v659_v21 = vadd.f32 %v1178_v16, %v1524_v37  ;;  %v687_v42 = vpack.c.bf16 %v678_v32, %v677_v38 }
 0x132   : > { %v1180_v19 = vpop.f32.mrf.mxu0 }
 0x133   : > { %v1181_v22 = vadd.f32 %v1180_v19, %v1179_v17  ;;  %v679_v28 = vmax.f32 %v659_v21, 0.0 }
 0x135   : > { %v662_v25 = vadd.f32 %v1181_v22, %v1524_v37  ;;  %v690_v37 = vld [vmem:[%s1441_s13] sm:$0xf] }
 0x137   : > { %v680_v29 = vmax.f32 %v662_v25, 0.0 }
 0x139   : > { %v688_v34 = vpack.c.bf16 %v680_v29, %v679_v28 }
 0x13b   : > { %1219 = vmatpush3.bf16.msra.mxu1 %v688_v34 }
 0x13c   : > { %1220 = vmatprep.subr.bf16.mxu1 %v1376_v33 }
 0x13f   : > { %1221 = vmatpush3.bf16.msra.mxu1 %v687_v42 }
 0x140   : > { %1222 = vmatprep.subr.bf16.mxu1 %v1376_v33 }
 0x143   : > { %1223 = vmatpush3.bf16.msra.mxu1 %v686_v50 }
 0x144   : > { %1224 = vmatprep.subr.bf16.mxu1 %v1376_v33 }
 0x147   : > { %1225 = vmatpush3.bf16.msra.mxu1 %v685_v55 }
 0x148   : > { %1226 = vmatprep.subr.bf16.mxu1 %v1376_v33 }
 0x14b   : > { %1227 = vmatpush3.bf16.msra.mxu1 %v684_v61 }
 0x14c   : > { %1228 = vmatprep.subr.bf16.mxu1 %v1376_v33 }
 0x14f   : > { %1229 = vmatpush3.bf16.msra.mxu1 %v683_v63 }
 0x150   : > { %1230 = vmatprep.subr.bf16.mxu1 %v1376_v33 }
 0x153   : > { %1231 = vmatpush3.bf16.msra.mxu1 %v1534_v60 }
 0x154   : > { %1232 = vmatprep.subr.bf16.mxu1 %v1376_v33 }
 0x157   : > { %1233 = vmatpush3.bf16.msra.mxu1 %v1528_v49 }
 0x158   : > { %1238 = vmatprep.subr.bf16.mxu1 %v1376_v33 }
 0x15a   : > { %1235 = vmatmul.mubr.bf16.vlgmr.msra.gmra.mxu1 %v690_v37 }
 0x15b   : > { %1239 = vmatpush3.bf16.msra.mxu1 %v688_v34  ;;  %1254 = vmatprep.mubr.msk.bf16.mxu1 %vm1377_vm0, %v1376_v33 }
 0x15c   : > { %1240 = vmatprep.subr.bf16.mxu1 %v1376_v33 }
 0x15f   : > { %1241 = vmatpush3.bf16.msra.mxu1 %v687_v42 }
 0x160   : > { %1242 = vmatprep.subr.bf16.mxu1 %v1376_v33 }
 0x163   : > { %1243 = vmatpush3.bf16.msra.mxu1 %v686_v50 }
 0x164   : > { %1244 = vmatprep.subr.bf16.mxu1 %v1376_v33 }
 0x167   : > { %1245 = vmatpush3.bf16.msra.mxu1 %v685_v55 }
 0x168   : > { %1246 = vmatprep.subr.bf16.mxu1 %v1376_v33 }
 0x16b   : > { %1247 = vmatpush3.bf16.msra.mxu1 %v684_v61 }
 0x16c   : > { %1248 = vmatprep.subr.bf16.mxu1 %v1376_v33 }
 0x16f   : > { %1249 = vmatpush3.bf16.msra.mxu1 %v683_v63 }
 0x170   : > { %1250 = vmatprep.subr.bf16.mxu1 %v1376_v33 }
 0x173   : > { %1251 = vmatpush3.bf16.msra.mxu1 %v1534_v60 }
 0x174   : > { %1252 = vmatprep.subr.bf16.mxu1 %v1376_v33 }
 0x177   : > { %1253 = vmatpush3.bf16.msra.mxu1 %v1528_v49 }
 0x17a   : > { %1255 = vmatmul.mubr.bf16.vlgmr.msra.gmra.mxu1 %v734_v58 }
 0x21a   : > { %v725_v1 = vpop.f32.mrf.mxu1 }
 0x21b   : > { %v731_v2 = vadd.f32 %v725_v1, %v689_v0 }
 0x21c   : > { %v1236_v3 = vpop.f32.mrf.mxu1 }
 0x21d   : > { %732 = vst [vmem:[#allocation2] sm:$0xff] %v731_v2 }
 0x21e   : > { %v728_v4 = vpop.f32.mrf.mxu1 }
 0x220   : > { %v1237_v5 = vpop.f32.mrf.mxu1 }
 0x23a   : > { %v769_v7 = vpop.f32.mrf.mxu1 }
 0x23b   : > { %v775_v8 = vadd.f32 %v769_v7, %v733_v6 }
 0x23c   : > { %v1256_v9 = vpop.f32.mrf.mxu1  ;;  %780 = sbr.rel (%p1097_p6) target bundleno = 810 (0x32a), region = 60 }
 0x23d   : > { %776 = vst [vmem:[#allocation3] sm:$0xff] %v775_v8 }
 0x23e   : > { %v772_v10 = vpop.f32.mrf.mxu1 }
 0x240   : > { %v1257_v60 = vpop.f32.mrf.mxu1 }
 0x241   : > { %v1351_v33 = vld [vmem:[%s1636_s6 + $0x38] sm:$0xff]   ;;  %v1378_v49 = vmov 0.0   ;;  %v1353_v12 = vld [vmem:[%s1636_s6 + $0x30] sm:$0xff]   ;;  %vm1379_vm1 = vmmov 0   ;;  %v1355_v14 = vld [vmem:[%s1636_s6 + $0x28] sm:$0xff]  }
 0x242   : > { %1258 = vmatprep.subr.bf16.mxu0 %v1378_v49  ;;  %1278 = vmatprep.subr.bf16.mxu1 %v1378_v49  ;;  %v1352_v11 = vld [vmem:[%s1635_s5 + $0x38] sm:$0xff]   ;;  %v1354_v13 = vld [vmem:[%s1635_s5 + $0x30] sm:$0xff]   ;;  %v1356_v15 = vld [vmem:[%s1635_s5 + $0x28] sm:$0xff]  }
 0x243   : > { %1259 = vmatpush3.bf16.msra.mxu0 %v1351_v33  ;;  %1274 = vmatprep.mubr.msk.bf16.mxu0 %vm1379_vm1, %v1378_v49  ;;  %v1357_v16 = vld [vmem:[%s1636_s6 + $0x20] sm:$0xff]   ;;  %v1359_v18 = vld [vmem:[%s1636_s6 + $0x18] sm:$0xff]   ;;  %v1361_v20 = vld [vmem:[%s1636_s6 + $0x10] sm:$0xff]  }
 0x244   : > { %1279 = vmatpush3.bf16.msra.mxu1 %v1352_v11  ;;  %1260 = vmatprep.subr.bf16.mxu0 %v1378_v49  ;;  %v1358_v17 = vld [vmem:[%s1635_s5 + $0x20] sm:$0xff]   ;;  %v1360_v19 = vld [vmem:[%s1635_s5 + $0x18] sm:$0xff]   ;;  %v1362_v21 = vld [vmem:[%s1635_s5 + $0x10] sm:$0xff]  }
 0x245   : > { %1280 = vmatprep.subr.bf16.mxu1 %v1378_v49  ;;  %1294 = vmatprep.mubr.msk.bf16.mxu1 %vm1379_vm1, %v1378_v49  ;;  %v1363_v22 = vld [vmem:[%s1636_s6 + $0x8] sm:$0xff]   ;;  %v1365_v24 = vld [vmem:[%s1636_s6] sm:$0xff]  }
 0x246   : > { %v1364_v23 = vld [vmem:[%s1635_s5 + $0x8] sm:$0xff]   ;;  %v1366_v26 = vld [vmem:[%s1635_s5] sm:$0xff]  }
 0x247   : > { %1261 = vmatpush3.bf16.msra.mxu0 %v1353_v12  ;;  %v799_v25 = vld [vmem:[#allocation3] sm:$0xff]  ;;  %v781_v27 = vld [vmem:[#allocation2] sm:$0xff] }
 0x248   : > { %1281 = vmatpush3.bf16.msra.mxu1 %v1354_v13  ;;  %1262 = vmatprep.subr.bf16.mxu0 %v1378_v49  ;;  %v800_v28 = vpack.c.bf16 %v799_v25, %v799_v25  ;;  %v782_v29 = vpack.c.bf16 %v781_v27, %v781_v27  ;;  %v1114_v32 = vld [vmem:[%s1637_s7] ss:$0 sm:$0xff] }
 0x249   : > { %1282 = vmatprep.subr.bf16.mxu1 %v1378_v49 }
 0x24b   : > { %1263 = vmatpush3.bf16.msra.mxu0 %v1355_v14 }
 0x24c   : > { %1283 = vmatpush3.bf16.msra.mxu1 %v1356_v15  ;;  %1264 = vmatprep.subr.bf16.mxu0 %v1378_v49 }
 0x24d   : > { %1284 = vmatprep.subr.bf16.mxu1 %v1378_v49 }
 0x24f   : > { %1265 = vmatpush3.bf16.msra.mxu0 %v1357_v16 }
 0x250   : > { %1285 = vmatpush3.bf16.msra.mxu1 %v1358_v17  ;;  %1266 = vmatprep.subr.bf16.mxu0 %v1378_v49 }
 0x251   : > { %1286 = vmatprep.subr.bf16.mxu1 %v1378_v49 }
 0x253   : > { %1267 = vmatpush3.bf16.msra.mxu0 %v1359_v18 }
 0x254   : > { %1287 = vmatpush3.bf16.msra.mxu1 %v1360_v19  ;;  %1268 = vmatprep.subr.bf16.mxu0 %v1378_v49 }
 0x255   : > { %1288 = vmatprep.subr.bf16.mxu1 %v1378_v49 }
 0x257   : > { %1269 = vmatpush3.bf16.msra.mxu0 %v1361_v20 }
 0x258   : > { %1289 = vmatpush3.bf16.msra.mxu1 %v1362_v21  ;;  %1270 = vmatprep.subr.bf16.mxu0 %v1378_v49 }
 0x259   : > { %1290 = vmatprep.subr.bf16.mxu1 %v1378_v49 }
 0x25b   : > { %1271 = vmatpush3.bf16.msra.mxu0 %v1363_v22 }
 0x25c   : > { %1291 = vmatpush3.bf16.msra.mxu1 %v1364_v23  ;;  %1272 = vmatprep.subr.bf16.mxu0 %v1378_v49 }
 0x25d   : > { %1292 = vmatprep.subr.bf16.mxu1 %v1378_v49 }
 0x25f   : > { %1273 = vmatpush3.bf16.msra.mxu0 %v1365_v24 }
 0x260   : > { %1293 = vmatpush3.bf16.msra.mxu1 %v1366_v26 }
 0x262   : > { %1275 = vmatmul.mubr.bf16.vlgmr.msra.gmra.mxu0 %v800_v28 }
 0x263   : > { %1295 = vmatmul.mubr.bf16.vlgmr.msra.gmra.mxu1 %v782_v29 }
 0x322   : > { %v899_v30 = vpop.f32.mrf.mxu0 }
 0x323   : > { %v987_v31 = vpop.f32.mrf.mxu1 }
 0x324   : > { %v988_v34 = vadd.f32 %v987_v31, %v899_v30  ;;  %v1276_v35 = vpop.f32.mrf.mxu0 }
 0x325   : > { %v1296_v36 = vpop.f32.mrf.mxu1 }
 0x326   : > { %v1000_v38 = vadd.f32 %v1114_v32, %v988_v34  ;;  %v902_v39 = vpop.f32.mrf.mxu0 }
 0x327   : > { %v990_v40 = vpop.f32.mrf.mxu1 }
 0x328   : > { %1001 = vst [vmem:[%s1638_s8] sm:$0xff] %v1000_v38  ;;  %v1277_v41 = vpop.f32.mrf.mxu0 }
 0x329   : > { %v1297_v42 = vpop.f32.mrf.mxu1 }
 0x32a PF: > { %s18_s27 = sadd.s32 1, %s1373_s27  }
 0x32b   : > { %p15_p7 = scmp.ge.s32.totalorder %s18_s27, 4  }
 0x32d   :  { %17 = sbr.rel (!%p15_p7) target bundleno = 1 (0x1), region = 92 }

</bundles_post_ra>
